<compile_context>
chip_gen: v7x
topology: tpu7x:2x2x1
jax: 0.10.0
libtpu: 0.0.40
codegen_flags: <defaults>
</compile_context>

<pallas_src>
import functools

import jax
import jax.numpy as jnp
from jax.experimental import pallas as pl
from jax.experimental.pallas import tpu as pltpu

# ---- model config (matches the PyTorch module layer lists) ----
NPOINTS = 16                                # vertices.shape[0] (small synthetic value)
BRANCH_LAYERS = [NPOINTS, 12, 12, 12, 4]
TRUNK_LAYERS = [3, 12, 12, 12, 4]
N_LAYERS = len(BRANCH_LAYERS) - 1           # 4 linear layers per net

F_FUSED = 36          # fused feature width (>= 16+16+3 inputs and >= 3*12 hidden)
OUT_DIM = BRANCH_LAYERS[-1]                 # 4
BRANCH_ROW = 0        # last-layer rows holding branch1 + branch2 (MXU-summed)
TRUNK_ROW = 8         # last-layer rows holding the trunk output (vreg-aligned)


# --------------------------------------------------------------------------- kernel
def deeponet_kernel(x_ref, w_ref, b_ref, o_ref, *, n_layers, compute_dtype):
    """Fused 3-MLP DeepONet forward on one row tile.

    x_ref: (F_FUSED, T)        compute_dtype   rows = [x1 | x2 | coords | pad]
    w_ref: (L, F_FUSED, F_FUSED) compute_dtype per-layer block-diagonal W^T
    b_ref: (L, F_FUSED, 1)     float32         per-layer fused bias (column vector)
    o_ref: (1, T)              float32         lane-dense per-row results
    """
    h = x_ref[...]
    for l in range(n_layers):
        # (F, F) @ (F, T) -> (F, T), f32 accumulation on the MXU.
        z = jnp.dot(w_ref[l], h, preferred_element_type=jnp.float32) + b_ref[l]
        if l < n_layers - 1:
            h = jnp.maximum(z, 0.0).astype(compute_dtype)   # ReLU f32, narrow MXU input
        else:
            h = z                                           # keep f32 for the epilogue

    # Last layer already holds (branch1 + branch2) at rows 0..3 and trunk at 8..11.
    br = h[BRANCH_ROW:BRANCH_ROW + OUT_DIM]                 # (4, T)
    tr = h[TRUNK_ROW:TRUNK_ROW + OUT_DIM]                   # (4, T)
    # torch.sum((b1 + b2) * trunk, dim=2, keepdim=True) -> sublane reduce, lane-dense.
    o_ref[...] = jnp.sum(br * tr, axis=0, keepdims=True)    # (1, T) f32


# ----------------------------------------------------------------- one-time packing
def pack_fused_params(params, compute_dtype=jnp.bfloat16):
    """Pack (branch1, branch2, trunk) params into block-diagonal W^T / bias slabs.

    Call ONCE at init (not per forward) — emits a chain of small update-slices.
    Last layer folds the branch1+branch2 add: both branches map to rows 0..3
    (biases summed), trunk to rows 8..11.
    """
    nets = list(params)                       # [(ws, bs)] * 3
    n_layers = len(nets[0][0])
    w_layers, b_layers = [], []
    col_offs = [0, NPOINTS, 2 * NPOINTS]      # layer-0 input offsets: [x1 | x2 | coords]
    for l in range(n_layers):
        last = l == n_layers - 1
        row_offs = [BRANCH_ROW, BRANCH_ROW, TRUNK_ROW] if last else [0, 12, 24]
        W = jnp.zeros((F_FUSED, F_FUSED), jnp.float32)
        b = jnp.zeros((F_FUSED, 1), jnp.float32)
        for n, (ws, bs) in enumerate(nets):
            w = ws[l]                         # (in, out)
            # .add is safe: blocks never overlap element-wise (branch1/branch2 share
            # output rows in the last layer but read disjoint input columns), and it
            # sums the two branch biases where rows coincide.
            W = W.at[row_offs[n]:row_offs[n] + w.shape[1],
                     col_offs[n]:col_offs[n] + w.shape[0]].add(w.T)
            b = b.at[row_offs[n]:row_offs[n] + w.shape[1], 0].add(bs[l])
        w_layers.append(W)
        b_layers.append(b)
        col_offs = row_offs                   # next layer consumes this layer's rows
    w_slab = jnp.stack(w_layers).astype(compute_dtype)      # (L, F, F)
    b_slab = jnp.stack(b_layers)                            # (L, F, 1) f32
    return w_slab, b_slab


def pack_inputs(x1, x2, coords, r_pad, compute_dtype=jnp.bfloat16):
    """Build the fused, transposed, zero-padded (F_FUSED, r_pad) input slab.

    Keep this with the data producer / hoist it out of the hot loop if the same
    inputs are reused — it reads+writes the whole input once in HBM.
    """
    B, M, _ = x1.shape
    R = B * M
    xcat = jnp.concatenate(
        [x1.reshape(R, -1), x2.reshape(R, -1), coords.reshape(R, -1)], axis=-1)
    feat = xcat.shape[-1]
    assert feat <= F_FUSED
    return jnp.pad(xcat.T, ((0, F_FUSED - feat), (0, r_pad - R))).astype(compute_dtype)


# --------------------------------------------------------------------- tile picking
def _round_up(x, m):
    return ((x + m - 1) // m) * m


def pick_row_tile(R, target=8192):
    """Large tiles to amortize per-step overhead, but >= 2 tiles when R allows
    (keeps both v7x TensorCores busy). Always a multiple of the 128-lane width."""
    half = _round_up(pl.cdiv(R, 2), 128)
    return max(128, min(_round_up(target, 128), half))


# ------------------------------------------------------------------------ apply
def deeponet_apply(x_slab, w_slab, b_slab, *, row_tile):
    """Run the fused kernel on a pre-packed (F_FUSED, r_pad) slab -> (1, r_pad) f32."""
    assert row_tile % 128 == 0
    F, r_pad = x_slab.shape
    assert F == F_FUSED and r_pad % row_tile == 0
    num_tiles = r_pad // row_tile
    compute_dtype = x_slab.dtype

    itemsize = jnp.dtype(compute_dtype).itemsize
    cost = pl.CostEstimate(
        flops=2 * r_pad * N_LAYERS * F_FUSED * F_FUSED + 2 * r_pad * OUT_DIM,
        transcendentals=0,
        bytes_accessed=(x_slab.size * itemsize + w_slab.size * itemsize
                        + b_slab.size * 4 + r_pad * 4),
    )

    kernel = functools.partial(deeponet_kernel, n_layers=N_LAYERS,
                               compute_dtype=compute_dtype)

    out = pl.pallas_call(
        kernel,
        out_shape=jax.ShapeDtypeStruct((1, r_pad), jnp.float32),
        grid=(num_tiles,),
        in_specs=[
            # (F_FUSED, row_tile) tile of the fused input, pipelined over row tiles.
            pl.BlockSpec((F_FUSED, row_tile), lambda i: (0, i)),
            # Tiny param slabs: whole-array blocks, constant block index -> the
            # pipeline skips the redundant DMA after the first grid step.
            pl.BlockSpec(w_slab.shape, lambda i: (0, 0, 0)),
            pl.BlockSpec(b_slab.shape, lambda i: (0, 0, 0)),
        ],
        # Lane-dense output: one (1, row_tile) block per grid step, unmasked stores.
        out_specs=pl.BlockSpec((1, row_tile), lambda i: (0, i)),
        compiler_params=pltpu.CompilerParams(dimension_semantics=("parallel",)),
        cost_estimate=cost,
    )(x_slab, w_slab, b_slab)
    return out


def deeponet_forward(x1, x2, coords, w_slab, b_slab, *, row_tile=None,
                     compute_dtype=jnp.bfloat16):
    """Convenience wrapper: (B, M, feat) inputs + pre-packed param slabs -> (B, M, 1)."""
    B, M, _ = x1.shape
    R = B * M
    if row_tile is None:
        row_tile = pick_row_tile(R)
    r_pad = pl.cdiv(R, row_tile) * row_tile
    x_slab = pack_inputs(x1, x2, coords, r_pad, compute_dtype)
    out = deeponet_apply(x_slab, w_slab, b_slab, row_tile=row_tile)
    return out.reshape(r_pad)[:R].reshape(B, M, 1)


# ---------------------------------------------------------------------- reference
def init_net_params(key, layers):
    ws, bs = [], []
    for i in range(len(layers) - 1):
        key, kw, kb = jax.random.split(key, 3)
        scale = 1.0 / jnp.sqrt(jnp.float32(layers[i]))
        ws.append(jax.random.uniform(kw, (layers[i], layers[i + 1]),
                                     jnp.float32, -scale, scale))
        bs.append(jax.random.uniform(kb, (layers[i + 1],),
                                     jnp.float32, -scale, scale))
    return ws, bs


def reference_forward(x1, x2, coords, params):
    (w1, b1), (w2, b2), (wt, bt) = params

    def mlp(x, ws, bs):
        h = x
        for i in range(len(ws)):
            h = h @ ws[i] + bs[i]
            if i < len(ws) - 1:
                h = jnp.maximum(h, 0.0)
        return h

    br = mlp(x1, w1, b1) + mlp(x2, w2, b2)
    tr = mlp(coords, wt, bt)
    return jnp.sum(br * tr, axis=2, keepdims=True)


if __name__ == "__main__":
    key = jax.random.PRNGKey(0)
    k1, k2, k3, kp1, kp2, kp3 = jax.random.split(key, 6)

    B, M = 2, 300   # batch, query points per sample -> R = 600 rows (exercises padding
                    # and the >=2-tile floor: auto row_tile = 384, 2 grid steps)
    input_data1 = jax.random.normal(k1, (B, M, NPOINTS), jnp.float32)
    input_data2 = jax.random.normal(k2, (B, M, NPOINTS), jnp.float32)
    spatial_coords = jax.random.normal(k3, (B, M, TRUNK_LAYERS[0]), jnp.float32)

    params = (
        init_net_params(kp1, BRANCH_LAYERS),   # branch_net1
        init_net_params(kp2, BRANCH_LAYERS),   # branch_net2
        init_net_params(kp3, TRUNK_LAYERS),    # trunk_net
    )

    ref = reference_forward(input_data1, input_data2, spatial_coords, params)

    # Param slabs are packed ONCE per dtype (init time), outside the forward path.
    w_f32, b_f32 = pack_fused_params(params, compute_dtype=jnp.float32)
    w_bf16, b_bf16 = pack_fused_params(params, compute_dtype=jnp.bfloat16)

    # f32 path (tight correctness check).
    out = deeponet_forward(input_data1, input_data2, spatial_coords, w_f32, b_f32,
                           compute_dtype=jnp.float32)
    out = jax.block_until_ready(out)
    assert out.shape == (B, M, 1)
    assert jnp.allclose(out, ref, rtol=1e-3, atol=1e-4)

    # Default bf16 path (halves HBM input/weight traffic; f32 MXU accumulation,
    # f32 biases / ReLU / epilogue).  Same large auto-picked row tile as f32.
    out_bf16 = deeponet_forward(input_data1, input_data2, spatial_coords,
                                w_bf16, b_bf16)
    out_bf16 = jax.block_until_ready(out_bf16)
    assert out_bf16.shape == (B, M, 1)
    assert jnp.allclose(out_bf16, ref, rtol=5e-2, atol=2e-2)

    # TODO(synk): optional fp8 x-slab path for v7x (bf16+fp8 MXU) behind a flag.
    print("KERNEL_OK")
</pallas_src>

<mosaic_0001>
module attributes {stable_mosaic.version = 11 : i64} {
  func.func @deeponet_kernel(%arg0: i32, %arg1: memref<36x384xf32, #tpu.memory_space<vmem>>, %arg2: memref<4x36x36xf32, #tpu.memory_space<vmem>>, %arg3: memref<4x36x1xf32, #tpu.memory_space<vmem>>, %arg4: memref<1x384xf32, #tpu.memory_space<vmem>>) attributes {dimension_semantics = [#tpu.dimension_semantics<parallel>], iteration_bounds = array<i64: 2>, scalar_prefetch = 0 : i64, scratch_operands = 0 : i64, tpu.core_type = #tpu.core_type<tc>, window_params = [{transform_indices = @transform_0, window_bounds = array<i64: 36, 384>}, {pipeline_mode = #tpu.pipeline_mode<synchronous>, transform_indices = @transform_1, window_bounds = array<i64: 4, 36, 36>}, {pipeline_mode = #tpu.pipeline_mode<synchronous>, transform_indices = @transform_2, window_bounds = array<i64: 4, 36, 1>}, {transform_indices = @transform_3, window_bounds = array<i64: 1, 384>}]} {
    %c0 = arith.constant 0 : index
    %c0_0 = arith.constant 0 : index
    %0 = vector.load %arg1[%c0, %c0_0] : memref<36x384xf32, #tpu.memory_space<vmem>>, vector<36x384xf32>
    %c0_1 = arith.constant 0 : index
    %c0_2 = arith.constant 0 : index
    %c0_3 = arith.constant 0 : index
    %1 = vector.load %arg2[%c0_1, %c0_2, %c0_3] : memref<4x36x36xf32, #tpu.memory_space<vmem>>, vector<1x36x36xf32>
    %2 = vector.shape_cast %1 : vector<1x36x36xf32> to vector<36x36xf32>
    %cst = arith.constant dense<0.000000e+00> : vector<36x384xf32>
    %3 = tpu.matmul %2, %0, %cst {dimension_numbers = #tpu.dot_dimension_numbers<[1], [0], [0], [1], [0, 0, 1, 1], [], []>} : vector<36x36xf32>, vector<36x384xf32>, vector<36x384xf32> -> vector<36x384xf32>
    %c0_4 = arith.constant 0 : index
    %c0_5 = arith.constant 0 : index
    %c0_6 = arith.constant 0 : index
    %4 = vector.load %arg3[%c0_4, %c0_5, %c0_6] : memref<4x36x1xf32, #tpu.memory_space<vmem>>, vector<1x36x1xf32>
    %5 = vector.shape_cast %4 : vector<1x36x1xf32> to vector<36x1xf32>
    %6 = vector.broadcast %5 : vector<36x1xf32> to vector<36x384xf32>
    %7 = arith.addf %3, %6 : vector<36x384xf32>
    %cst_7 = arith.constant 0.000000e+00 : f32
    %8 = vector.broadcast %cst_7 : f32 to vector<36x384xf32>
    %9 = arith.maximumf %7, %8 : vector<36x384xf32>
    %c1 = arith.constant 1 : index
    %c0_8 = arith.constant 0 : index
    %c0_9 = arith.constant 0 : index
    %10 = vector.load %arg2[%c1, %c0_8, %c0_9] : memref<4x36x36xf32, #tpu.memory_space<vmem>>, vector<1x36x36xf32>
    %11 = vector.shape_cast %10 : vector<1x36x36xf32> to vector<36x36xf32>
    %cst_10 = arith.constant dense<0.000000e+00> : vector<36x384xf32>
    %12 = tpu.matmul %11, %9, %cst_10 {dimension_numbers = #tpu.dot_dimension_numbers<[1], [0], [0], [1], [0, 0, 1, 1], [], []>} : vector<36x36xf32>, vector<36x384xf32>, vector<36x384xf32> -> vector<36x384xf32>
    %c1_11 = arith.constant 1 : index
    %c0_12 = arith.constant 0 : index
    %c0_13 = arith.constant 0 : index
    %13 = vector.load %arg3[%c1_11, %c0_12, %c0_13] : memref<4x36x1xf32, #tpu.memory_space<vmem>>, vector<1x36x1xf32>
    %14 = vector.shape_cast %13 : vector<1x36x1xf32> to vector<36x1xf32>
    %15 = vector.broadcast %14 : vector<36x1xf32> to vector<36x384xf32>
    %16 = arith.addf %12, %15 : vector<36x384xf32>
    %cst_14 = arith.constant 0.000000e+00 : f32
    %17 = vector.broadcast %cst_14 : f32 to vector<36x384xf32>
    %18 = arith.maximumf %16, %17 : vector<36x384xf32>
    %c2 = arith.constant 2 : index
    %c0_15 = arith.constant 0 : index
    %c0_16 = arith.constant 0 : index
    %19 = vector.load %arg2[%c2, %c0_15, %c0_16] : memref<4x36x36xf32, #tpu.memory_space<vmem>>, vector<1x36x36xf32>
    %20 = vector.shape_cast %19 : vector<1x36x36xf32> to vector<36x36xf32>
    %cst_17 = arith.constant dense<0.000000e+00> : vector<36x384xf32>
    %21 = tpu.matmul %20, %18, %cst_17 {dimension_numbers = #tpu.dot_dimension_numbers<[1], [0], [0], [1], [0, 0, 1, 1], [], []>} : vector<36x36xf32>, vector<36x384xf32>, vector<36x384xf32> -> vector<36x384xf32>
    %c2_18 = arith.constant 2 : index
    %c0_19 = arith.constant 0 : index
    %c0_20 = arith.constant 0 : index
    %22 = vector.load %arg3[%c2_18, %c0_19, %c0_20] : memref<4x36x1xf32, #tpu.memory_space<vmem>>, vector<1x36x1xf32>
    %23 = vector.shape_cast %22 : vector<1x36x1xf32> to vector<36x1xf32>
    %24 = vector.broadcast %23 : vector<36x1xf32> to vector<36x384xf32>
    %25 = arith.addf %21, %24 : vector<36x384xf32>
    %cst_21 = arith.constant 0.000000e+00 : f32
    %26 = vector.broadcast %cst_21 : f32 to vector<36x384xf32>
    %27 = arith.maximumf %25, %26 : vector<36x384xf32>
    %c3 = arith.constant 3 : index
    %c0_22 = arith.constant 0 : index
    %c0_23 = arith.constant 0 : index
    %28 = vector.load %arg2[%c3, %c0_22, %c0_23] : memref<4x36x36xf32, #tpu.memory_space<vmem>>, vector<1x36x36xf32>
    %29 = vector.shape_cast %28 : vector<1x36x36xf32> to vector<36x36xf32>
    %cst_24 = arith.constant dense<0.000000e+00> : vector<36x384xf32>
    %30 = tpu.matmul %29, %27, %cst_24 {dimension_numbers = #tpu.dot_dimension_numbers<[1], [0], [0], [1], [0, 0, 1, 1], [], []>} : vector<36x36xf32>, vector<36x384xf32>, vector<36x384xf32> -> vector<36x384xf32>
    %c3_25 = arith.constant 3 : index
    %c0_26 = arith.constant 0 : index
    %c0_27 = arith.constant 0 : index
    %31 = vector.load %arg3[%c3_25, %c0_26, %c0_27] : memref<4x36x1xf32, #tpu.memory_space<vmem>>, vector<1x36x1xf32>
    %32 = vector.shape_cast %31 : vector<1x36x1xf32> to vector<36x1xf32>
    %33 = vector.broadcast %32 : vector<36x1xf32> to vector<36x384xf32>
    %34 = arith.addf %30, %33 : vector<36x384xf32>
    %35 = vector.extract_strided_slice %34 {offsets = [0, 0], sizes = [4, 384], strides = [1, 1]} : vector<36x384xf32> to vector<4x384xf32>
    %36 = vector.extract_strided_slice %34 {offsets = [8, 0], sizes = [4, 384], strides = [1, 1]} : vector<36x384xf32> to vector<4x384xf32>
    %37 = arith.mulf %35, %36 : vector<4x384xf32>
    %cst_28 = arith.constant dense<0.000000e+00> : vector<384xf32>
    %38 = vector.multi_reduction <add>, %37, %cst_28 [0] : vector<4x384xf32> to vector<384xf32>
    %39 = vector.shape_cast %38 : vector<384xf32> to vector<1x384xf32>
    %c0_29 = arith.constant 0 : index
    %c0_30 = arith.constant 0 : index
    %40 = vector.load %arg4[%c0_29, %c0_30] : memref<1x384xf32, #tpu.memory_space<vmem>>, vector<1x384xf32>
    tpu.vector_store %arg4[%c0_29, %c0_30], %39 {strides = array<i32>} : memref<1x384xf32, #tpu.memory_space<vmem>>, vector<1x384xf32>,
    return
  }
  func.func @transform_0(%arg0: i32) -> (i32, i32) {
    %c0_i32 = arith.constant 0 : i32
    %c0_i32_0 = arith.constant 0 : i32
    return %c0_i32, %arg0 : i32, i32
  }
  func.func @transform_1(%arg0: i32) -> (i32, i32, i32) {
    %c0_i32 = arith.constant 0 : i32
    %c0_i32_0 = arith.constant 0 : i32
    %c0_i32_1 = arith.constant 0 : i32
    %c0_i32_2 = arith.constant 0 : i32
    return %c0_i32, %c0_i32_0, %c0_i32_1 : i32, i32, i32
  }
  func.func @transform_2(%arg0: i32) -> (i32, i32, i32) {
    %c0_i32 = arith.constant 0 : i32
    %c0_i32_0 = arith.constant 0 : i32
    %c0_i32_1 = arith.constant 0 : i32
    %c0_i32_2 = arith.constant 0 : i32
    return %c0_i32, %c0_i32_0, %c0_i32_1 : i32, i32, i32
  }
  func.func @transform_3(%arg0: i32) -> (i32, i32) {
    %c0_i32 = arith.constant 0 : i32
    %c0_i32_0 = arith.constant 0 : i32
    return %c0_i32, %arg0 : i32, i32
  }
}

</mosaic_0001>

<bundles_post_ra>
// kernel: tpu_custom_call.1
= control target key start
LH: loop header
LB: loop body
LE: loop exit
PB: predicated region body
PF: predicated region fallthrough
CT: control target
= control target key end

     0   :  { %8 = vsyncpa [#allocation4], 0  ;;  %s2179_s0 = inlined_call_operand.vmem [shape: f32[36,768], index: 0, kind: input, shape index: {}]   ;;  %s2180_s1 = inlined_call_operand.vmem [shape: f32[4,36,36], index: 1, kind: input, shape index: {}]   ;;  %s2181_s2 = inlined_call_operand.vmem [shape: f32[4,36,1], index: 2, kind: input, shape index: {}]   ;;  %s2182_s3 = inlined_call_operand.hbm [shape: f32[1,768], index: 3, kind: output, shape index: {}]  }
   0x1   :  { %10 = vsyncpa [#allocation4 + $0x1], 0  ;;  %s1814_s12 = smov 0   ;;  %s1816_s13 = smov 0  }
   0x2   :  { %s1818_s14 = smov 0   ;;  %s1820_s15 = smov 0  }
   0x3 LB: > { %s1386_s16 = sadd.s32 4294967295, %s1786_s15   ;;  %s1387_s17 = sadd.s32 4294967294, %s1786_s15   ;;  %s1786_s15 = sphi %s1820_s15, %s2188_s15   ;;  %s1782_s14 = sphi %s1818_s14, %s2187_s14   ;;  %s1778_s13 = sphi %s1816_s13, %s2186_s13   ;;  %s1774_s12 = sphi %s1814_s12, %s2185_s12  }
   0x4   : > { %s1837_s18 = sadd.s32 1, %s1786_s15   ;;  %s23_s19 = sadd.s32 1, %s1782_s14 }
   0x5   : > { %s20_s20 = ssub.s32 %s1786_s15, %s1837_s18  ;;  %p30_p0 = scmp.ne.s32.totalorder %s1782_s14, %s1778_s13 }
   0x6   : > { %p21_p1 = scmp.eq.s32.totalorder %s20_s20, 0  ;;  %p31_p2 = scmp.eq.s32.totalorder %s1786_s15, 0 }
   0x7   : > { %p102_p3 = scmp.eq.s32.totalorder %s1386_s16, 1  ;;  %p107_p4 = scmp.ne.s32.totalorder %s1778_s13, %s1774_s12 }
   0x8   : > { %s1850_s21 = scalar_select %p21_p1, %s1782_s14, %s23_s19  }
   0x9   : > { %p32_p5 = por %p31_p2, %p30_p0  ;;  %p1852_p6 = por %p102_p3, %p30_p0 }
   0xa   : > { %p108_p7 = scmp.eq.s32.totalorder %s1387_s17, 1  ;;  %p1389_p9 = scmp.ge.s32.totalorder %s1786_s15, 2 }
   0xc   : > { %p1856_p8 = por %p108_p7, %p107_p4  ;;  %130 = sbr.rel (%p1389_p9) target bundleno = 32 (0x20), region = 24 }
  0x13   : > { %133 = sbr.rel (!%p32_p5) target bundleno = 32 (0x20), region = 28  ;;  %s135_s24 = sand.u32 (%p32_p5), 1, %s1782_s14  }
  0x14   : > { %s1477_s25 = smul.u32 (%p32_p5), 24, %s1786_s15 }
  0x15   : > { %s1675_s26 = smul.u32 (%p32_p5), 120, %s135_s24 }
  0x16   : > { %s140_s29 = scalar_lea.vmem (%p32_p5), %s2179_s0, %s1477_s25 }
  0x17   : > { %v153_v0 = vld [vmem:[%s140_s29] sm:$0xff] (%p32_p5)  ;;  %v155_v1 = vld [vmem:[%s140_s29 + $0x8] sm:$0xff] (%p32_p5)  ;;  %v157_v2 = vld [vmem:[%s140_s29 + $0x10] sm:$0xff] (%p32_p5)  ;;  %s137_s30 = scalar_lea.vmem (%p32_p5), [#allocation2], %s1675_s26 }
  0x18   : > { %154 = vst [vmem:[%s137_s30] sm:$0xff] (%p32_p5), %v153_v0  ;;  %156 = vst [vmem:[%s137_s30 + $0x8] sm:$0xff] (%p32_p5), %v155_v1  ;;  %v159_v3 = vld [vmem:[%s140_s29 + $0x30] sm:$0xff] (%p32_p5)  ;;  %v161_v4 = vld [vmem:[%s140_s29 + $0x38] sm:$0xff] (%p32_p5) }
  0x19   : > { %158 = vst [vmem:[%s137_s30 + $0x10] sm:$0xff] (%p32_p5), %v157_v2  ;;  %v163_v5 = vld [vmem:[%s140_s29 + $0x40] sm:$0xff] (%p32_p5)  ;;  %160 = vst [vmem:[%s137_s30 + $0x18] sm:$0xff] (%p32_p5), %v159_v3  ;;  %v167_v7 = vld [vmem:[%s140_s29 + $0x68] sm:$0xff] (%p32_p5) }
  0x1a   : > { %162 = vst [vmem:[%s137_s30 + $0x20] sm:$0xff] %v161_v4  ;;  %164 = vst [vmem:[%s137_s30 + $0x28] sm:$0xff] %v163_v5  ;;  %v165_v6 = vld [vmem:[%s140_s29 + $0x60] sm:$0xff]  ;;  %v169_v8 = vld [vmem:[%s140_s29 + $0x70] sm:$0xff] }
  0x1b   : > { %166 = vst [vmem:[%s137_s30 + $0x30] sm:$0xff] %v165_v6  ;;  %168 = vst [vmem:[%s137_s30 + $0x38] sm:$0xff] %v167_v7  ;;  %v171_v9 = vld [vmem:[%s140_s29 + $0x90] sm:$0xff]  ;;  %v173_v10 = vld [vmem:[%s140_s29 + $0x98] sm:$0xff] }
  0x1c   : > { %170 = vst [vmem:[%s137_s30 + $0x40] sm:$0xff] %v169_v8  ;;  %v175_v11 = vld [vmem:[%s140_s29 + $0xa0] sm:$0xff]  ;;  %172 = vst [vmem:[%s137_s30 + $0x48] sm:$0xff] %v171_v9  ;;  %v179_v13 = vld [vmem:[%s140_s29 + $0xc8] sm:$0xff] }
  0x1d   : > { %174 = vst [vmem:[%s137_s30 + $0x50] sm:$0xff] %v173_v10  ;;  %176 = vst [vmem:[%s137_s30 + $0x58] sm:$0xff] %v175_v11  ;;  %v177_v12 = vld [vmem:[%s140_s29 + $0xc0] sm:$0xff]  ;;  %v181_v14 = vld [vmem:[%s140_s29 + $0xd0] sm:$0xff] }
  0x1e   : > { %178 = vst [vmem:[%s137_s30 + $0x60] sm:$0xff] %v177_v12  ;;  %180 = vst [vmem:[%s137_s30 + $0x68] sm:$0xff] %v179_v13 }
  0x1f   : > { %182 = vst [vmem:[%s137_s30 + $0x70] sm:$0xff] %v181_v14 }
  0x20 PF: > { %p1391_p10 = scmp.ge.s32.totalorder %s1786_s15, 1  ;;  %p187_p11 = scmp.lt.s32.totalorder %s1786_s15, 3 }
  0x22   : > { %p188_p12 = pnand %p1391_p10, %p187_p11 }
  0x23   : > { %s1871_s4 = sand.u32 (!%p188_p12), 1, %s1778_s13   ;;  %v1788_v15 = vmov (!%p188_p12), 0.0|0.0   ;;  %vm1789_vm0 = vmmov (!%p188_p12), 0   ;;  %v1790_v16 = vmov (!%p188_p12), 0.0   ;;  %v1791_v17 = vmov (!%p188_p12), 0   ;;  %v239_v18 = vld [vmem:[%s2181_s2] sm:$0xff] (!%p188_p12) }
  0x24   : > { %191 = sbr.rel (%p188_p12) target bundleno = 1020 (0x3fc), region = 51  ;;  %1627 = vmatprep.subr.bf16.mxu1 (!%p188_p12), %v1788_v15  ;;  %1529 = vmatprep.mubr.msk.f32.mxu1 (!%p188_p12), %vm1789_vm0, %v1790_v16  ;;  %v240_v19 = vld [vmem:[%s2181_s2 + $0x8] sm:$0xff] (!%p188_p12)  ;;  %v241_v20 = vld [vmem:[%s2181_s2 + $0x10] sm:$0xff] (!%p188_p12)  ;;  %v243_v39 = vld [vmem:[%s2181_s2 + $0x20] sm:$0xf] (!%p188_p12)  ;;  %vm285_vm1 = vcmask (!%p188_p12), 1043456  }
  0x25   : > { %s1676_s5 = smul.u32 (!%p188_p12), 120, %s1871_s4  ;;  %359 = vmatprep.mubr.f32.mxu0 (!%p188_p12), %v1790_v16  ;;  %1722 = vset.pattern.permute.xlu0 (!%p188_p12), %v1791_v17  ;;  %v242_v40 = vld [vmem:[%s2181_s2 + $0x18] sm:$0xff] (!%p188_p12)  ;;  %v1410_v42 = vld [vmem:[%s2181_s2 + $0x28] sm:$0xff] (!%p188_p12)  ;;  %v1411_v43 = vld [vmem:[%s2181_s2 + $0x30] sm:$0xff] (!%p188_p12)  ;;  %vm269_vm2 = vcmask (!%p188_p12), 293888   ;;  %s1308_s29 = scalar_lea.sflag (!%p188_p12), [#allocation4], %s1871_s4 }
  0x26   : > { %246 = vperm.xlu0 (!%p188_p12), %1722, %v239_v18   ;;  %1723 = vset.pattern.permute.xlu1 (!%p188_p12), %v1791_v17  ;;  %v234_v46 = vld [vmem:[%s2180_s1] sm:$0xff] (!%p188_p12)  ;;  %v1412_v48 = vld [vmem:[%s2181_s2 + $0x38] sm:$0xff] (!%p188_p12)  ;;  %v235_v49 = vld [vmem:[%s2180_s1 + $0x8] sm:$0xff] (!%p188_p12)  ;;  %s1677_s19 = smul.u32 (!%p188_p12), 3, %s1871_s4 }
  0x27   : > { %s1887_s17 = scalar_lea.vmem (!%p188_p12), [#allocation2], %s1676_s5  ;;  %256 = vperm.xlu1 (!%p188_p12), %1723, %v241_v20   ;;  %v1413_v47 = vld [vmem:[%s2181_s2 + $0x40] sm:$0xff] (!%p188_p12)  ;;  %v1433_v50 = vld [vmem:[%s2181_s2 + $0x50] sm:$0xff] (!%p188_p12)  ;;  %v1414_v51 = vld [vmem:[%s2181_s2 + $0x48] sm:$0xf] (!%p188_p12)  ;;  %s1478_s20 = smul.u32 (!%p188_p12), 48, %s1386_s16 }
  0x28   : > { %v220_v21 = vld [vmem:[%s1887_s17 + $0x8] sm:$0xff] (!%p188_p12)  ;;  %v223_v22 = vld [vmem:[%s1887_s17 + $0x20] sm:$0xff] (!%p188_p12)  ;;  %v221_v23 = vld [vmem:[%s1887_s17 + $0x10] sm:$0xff] (!%p188_p12)  ;;  %s216_s24 = scalar_lea.vmem (!%p188_p12), [#allocation3], %s1677_s19  ;;  %s1793_s16 = smov (!%p188_p12), [#allocation3]  }
  0x29   : > { %v1619_v24 = vpack.c.bf16 (!%p188_p12), %v223_v22, %v220_v21  ;;  %v224_v25 = vld [vmem:[%s1887_s17 + $0x28] sm:$0xff] (!%p188_p12)  ;;  %v219_v26 = vld [vmem:[%s1887_s17] sm:$0xff] (!%p188_p12)  ;;  %v222_v27 = vld [vmem:[%s1887_s17 + $0x18] sm:$0xff] (!%p188_p12)  ;;  %s1322_s25 = sshll.u32 (!%p188_p12), %s216_s24, 4  ;;  %s2135_s28 = scalar_lea.hbm (!%p188_p12), %s2182_s3, %s1478_s20  ;;  %s2137_s25 = int_to_ptr.vmem [resolvable:$true] %s1322_s25 }
  0x2a   : > { %v1628_v28 = vpack.c.bf16 (!%p188_p12), %v224_v25, %v221_v23  ;;  %v1621_v29 = vpack.c.bf16 (!%p188_p12), %v222_v27, %v219_v26  ;;  %v226_v30 = vld [vmem:[%s1887_s17 + $0x38] sm:$0xff] (!%p188_p12)  ;;  %v229_v31 = vld [vmem:[%s1887_s17 + $0x50] sm:$0xff] (!%p188_p12)  ;;  %v227_v32 = vld [vmem:[%s1887_s17 + $0x40] sm:$0xff] (!%p188_p12)  ;;  %251 = vperm.xlu0 (!%p188_p12), %1722, %v240_v19   ;;  %s1724_s30 = scalar_lea.vmem (!%p188_p12), %s2137_s25, 48  ;;  %s1728_s5 = sshll.u32 (!%p188_p12), %s1793_s16, 4  ;;  %s1729_s5 = int_to_ptr.vmem [resolvable:$false] %s1728_s5 }
  0x2b   : > { %1620 = vmatprep.subr.bf16.mxu0 %v1619_v24  ;;  %v1623_v33 = vpack.c.bf16 %v229_v31, %v226_v30  ;;  %v230_v34 = vld [vmem:[%s1887_s17 + $0x58] sm:$0xff]  ;;  %v225_v35 = vld [vmem:[%s1887_s17 + $0x30] sm:$0xff]  ;;  %v228_v36 = vld [vmem:[%s1887_s17 + $0x48] sm:$0xff]  ;;  %261 = vperm.xlu1 %1723, %v242_v40   ;;  %p1725_p13 = scmp.ne.s32.totalorder %s2137_s25, %s1724_s30  ;;  %s1730_s6 = scalar_lea.vmem %s1729_s5, 96 }
  0x2c   : > { %1629 = vmatpush3.bf16.msra.mxu1 %v1628_v28  ;;  %1622 = vmatpush1.bf16.msra.mxu0 %v1621_v29  ;;  %v1631_v37 = vpack.c.bf16 %v230_v34, %v227_v32  ;;  %v1625_v38 = vpack.c.bf16 %v228_v36, %v225_v35  ;;  %v232_v41 = vld [vmem:[%s1887_s17 + $0x68] sm:$0xf]  ;;  %v233_v44 = vld [vmem:[%s1887_s17 + $0x70] sm:$0xf]  ;;  %v231_v45 = vld [vmem:[%s1887_s17 + $0x60] sm:$0xf]  ;;  %p1731_p2 = scmp.lt.s32.totalorder %s2137_s25, %s1729_s5  ;;  %p1732_p3 = scmp.lt.s32.totalorder %s1730_s6, %s1724_s30 }
  0x2d   : > { %1630 = vmatprep.subr.bf16.mxu1 %v1788_v15  ;;  %1624 = vmatprep.subr.bf16.mxu0 %v1623_v33  ;;  %v236_v52 = vld [vmem:[%s2180_s1 + $0x10] sm:$0xff]  ;;  %v1435_v53 = vld [vmem:[%s2181_s2 + $0x60] sm:$0xff]  ;;  %v1434_v54 = vld [vmem:[%s2181_s2 + $0x58] sm:$0xff]  ;;  %p1726_p0 = pnand %p1725_p13, %p1852_p6 }
  0x2e   : > { %266 = vperm.xlu0 %1722, %v243_v39   ;;  %v237_v55 = vld [vmem:[%s2180_s1 + $0x18] sm:$0xff]  ;;  %v1437_v56 = vld [vmem:[%s2181_s2 + $0x70] sm:$0xf]  ;;  %v1436_v57 = vld [vmem:[%s2181_s2 + $0x68] sm:$0xff]  ;;  %p1733_p4 = por %p1732_p3, %p1731_p2 }
  0x2f   : > { %509 = vperm.xlu1 %1723, %v1410_v42   ;;  %v238_v58 = vld [vmem:[%s2180_s1 + $0x20] sm:$0xf]  ;;  %v1456_v60 = vld [vmem:[%s2181_s2 + $0x78] sm:$0xff]  ;;  %p1727_p1 = pneg %p1726_p0 }
  0x30   : > { %1632 = vmatpush3.bf16.msra.mxu1 %v1631_v37  ;;  %1626 = vmatpush1.bf16.msra.mxu0 %v1625_v38  ;;  %v1457_v59 = vld [vmem:[%s2181_s2 + $0x80] sm:$0xff] }
  0x31   : > { %1527 = vmatprep.subr.mxu1 %v1790_v16  ;;  %1392 = vmatprep.subr.msk.mxu0 %vm285_vm1, %v232_v41  ;;  %p1734_p5 = pnand %p1733_p4, %p1727_p1 }
  0x32   : > { %514 = vperm.xlu0 %1722, %v1411_v43  }
  0x33   : > { %519 = vperm.xlu1 %1723, %v1412_v48  }
  0x34   : > { %1528 = vmatpush3.msk.msra.mxu1 %vm285_vm1, %v233_v44  ;;  %1393 = vmatpush1.msk.msra.mxu0 %vm285_vm1, %v231_v45 }
  0x35   : > { %1530 = vmatmul.mubr.msk.f32.vlgmr.msra.gmra.mrb[0].mxu1 %vm269_vm2, %v234_v46  ;;  %1394 = vmatmul.mubr.msk.f32.vlgmr.msra.gmra.mrb[0].mxu0 %vm269_vm2, %v234_v46 }
  0x36   : > { %1532 = vmatprep.mubr.msk.f32.mxu1 %vm1789_vm0, %v1790_v16  ;;  %365 = vmatprep.mubr.f32.mxu0 %v1790_v16 }
  0x37   : > { %524 = vperm.xlu0 %1722, %v1413_v47   ;;  %1641 = vmatprep.subr.bf16.mxu1 %v1788_v15 }
  0x38   : > { %529 = vperm.xlu1 %1723, %v1414_v51  }
  0x39   : > { %1533 = vmatmul.mubr.msk.f32.gmra.mrb[2].mxu1 %vm269_vm2, %v235_v49  ;;  %1395 = vmatmul.mubr.msk.f32.gmra.mrb[2].mxu0 %vm269_vm2, %v235_v49 }
  0x3a   : > { %1535 = vmatprep.mubr.msk.f32.mxu1 %vm1789_vm0, %v1790_v16  ;;  %371 = vmatprep.mubr.f32.mxu0 %v1790_v16 }
  0x3b   : > { %770 = vperm.xlu0 %1722, %v1433_v50  }
  0x3c   : > { %775 = vperm.xlu1 %1723, %v1434_v54  }
  0x3d   : > { %1536 = vmatmul.mubr.msk.f32.gmra.mrb[4].mxu1 %vm269_vm2, %v236_v52  ;;  %1396 = vmatmul.mubr.msk.f32.gmra.mrb[4].mxu0 %vm269_vm2, %v236_v52 }
  0x3e   : > { %1538 = vmatprep.mubr.msk.f32.mxu1 %vm1789_vm0, %v1790_v16  ;;  %377 = vmatprep.mubr.f32.mxu0 %v1790_v16 }
  0x3f   : > { %780 = vperm.xlu0 %1722, %v1435_v53  }
  0x40   : > { %785 = vperm.xlu1 %1723, %v1436_v57  }
  0x41   : > { %1539 = vmatmul.mubr.msk.f32.gmra.mrb[6].mxu1 %vm269_vm2, %v237_v55  ;;  %1397 = vmatmul.mubr.msk.f32.gmra.mrb[6].mxu0 %vm269_vm2, %v237_v55 }
  0x42   : > { %1541 = vmatprep.mubr.msk.f32.mxu1 %vm1789_vm0, %v1790_v16  ;;  %383 = vmatprep.mubr.f32.mxu0 %v1790_v16 }
  0x43   : > { %790 = vperm.xlu0 %1722, %v1437_v56  }
  0x44   : > { %1031 = vperm.xlu1 %1723, %v1456_v60  }
  0x45   : > { %1542 = vmatmul.mubr.msk.f32.gmra.mrb[8].mxu1 %vm269_vm2, %v238_v58  ;;  %1398 = vmatmul.mubr.msk.f32.gmra.mrb[8].mxu0 %vm269_vm2, %v238_v58 }
  0x46   : > { %1554 = vmatprep.mubr.msk.f32.mxu1 %vm1789_vm0, %v1790_v16  ;;  %620 = vmatprep.mubr.f32.mxu0 %v1790_v16 }
  0x47   : > { %1036 = vperm.xlu0 %1722, %v1457_v59   ;;  %v1405_v59 = vld [vmem:[%s2180_s1 + $0x28] sm:$0xff] }
  0xa5   : > { %v247_v61 = vpop.permute.xlu0 %246 }
  0xa6   : > { %v257_v4 = vpop.permute.xlu1 %256 }
  0xa9   : > { %v252_v3 = vpop.permute.xlu0 %251 }
  0xaa   : > { %v262_v29 = vpop.permute.xlu1 %261 }
  0xad   : > { %v267_v40 = vpop.permute.xlu0 %266 }
 0x108   : > { %v361_v62 = vpop.f32.mrb[0].mxu0  ;;  %v456_v63 = vpop.f32.mrb[0].mxu1 }
 0x109   : > { %v363_v0 = vpop.f32.mrb[1].mxu0  ;;  %v457_v1 = vadd.f32 %v456_v63, %v247_v61  ;;  %v1531_v2 = vpop.f32.mrb[1].mxu1  ;;  %v362_v5 = vadd.f32 %v361_v62, %v247_v61  ;;  %v1407_v62 = vld [vmem:[%s2180_s1 + $0x38] sm:$0xff]  ;;  %v1408_v63 = vld [vmem:[%s2180_s1 + $0x40] sm:$0xff] }
 0x10a   : > { %v364_v6 = vadd.f32 %v363_v0, %v247_v61  ;;  %v1406_v61 = vld [vmem:[%s2180_s1 + $0x30] sm:$0xff]  ;;  %v1409_v0 = vld [vmem:[%s2180_s1 + $0x48] sm:$0xf] }
 0x10b   : > { %v482_v9 = vmax.f32 %v457_v1, 0.0  ;;  %v480_v17 = vmax.f32 %v362_v5, 0.0 }
 0x10c   : > { %v461_v7 = vpop.f32.mrb[2].mxu1  ;;  %v367_v8 = vpop.f32.mrb[2].mxu0  ;;  %v481_v20 = vmax.f32 %v364_v6, 0.0 }
 0x10d   : > { %v462_v10 = vadd.f32 %v461_v7, %v252_v3  ;;  %v368_v11 = vadd.f32 %v367_v8, %v252_v3  ;;  %v369_v12 = vpop.f32.mrb[3].mxu0  ;;  %v1534_v13 = vpop.f32.mrb[3].mxu1 }
 0x10e   : > { %v370_v14 = vadd.f32 %v369_v12, %v252_v3  ;;  %v510_v3 = vpop.permute.xlu1 %509  ;;  %v515_v7 = vpop.permute.xlu0 %514 }
 0x10f   : > { %v485_v18 = vmax.f32 %v462_v10, 0.0  ;;  %v483_v19 = vmax.f32 %v368_v11, 0.0 }
 0x110   : > { %v484_v21 = vmax.f32 %v370_v14, 0.0  ;;  %v373_v22 = vpop.f32.mrb[4].mxu0  ;;  %v466_v23 = vpop.f32.mrb[4].mxu1 }
 0x111   : > { %v1642_v24 = vpack.c.bf16 %v485_v18, %v482_v9  ;;  %v1635_v25 = vpack.c.bf16 %v483_v19, %v480_v17  ;;  %v375_v26 = vpop.f32.mrb[5].mxu0  ;;  %v1537_v27 = vpop.f32.mrb[5].mxu1  ;;  %v374_v30 = vadd.f32 %v373_v22, %v257_v4  ;;  %v467_v31 = vadd.f32 %v466_v23, %v257_v4 }
 0x112   : > { %v1633_v28 = vpack.c.bf16 %v484_v21, %v481_v20  ;;  %v376_v32 = vadd.f32 %v375_v26, %v257_v4  ;;  %v520_v26 = vpop.permute.xlu1 %519 }
 0x113   : > { %1643 = vmatpush3.bf16.msra.mxu1 %v1642_v24  ;;  %v486_v41 = vmax.f32 %v374_v30, 0.0  ;;  %v488_v42 = vmax.f32 %v467_v31, 0.0 }
 0x114   : > { %v471_v33 = vpop.f32.mrb[6].mxu1  ;;  %v379_v34 = vpop.f32.mrb[6].mxu0  ;;  %1634 = vmatprep.subr.bf16.mxu0 %v1633_v28  ;;  %1644 = vmatprep.subr.bf16.mxu1 %v1788_v15  ;;  %v487_v45 = vmax.f32 %v376_v32, 0.0 }
 0x115   : > { %v472_v35 = vadd.f32 %v471_v33, %v262_v29  ;;  %v380_v36 = vadd.f32 %v379_v34, %v262_v29  ;;  %v381_v37 = vpop.f32.mrb[7].mxu0  ;;  %1636 = vmatpush1.bf16.msra.mxu0 %v1635_v25  ;;  %v1540_v38 = vpop.f32.mrb[7].mxu1 }
 0x116   : > { %v382_v39 = vadd.f32 %v381_v37, %v262_v29  ;;  %v525_v33 = vpop.permute.xlu0 %524 }
 0x117   : > { %v491_v43 = vmax.f32 %v472_v35, 0.0  ;;  %v489_v44 = vmax.f32 %v380_v36, 0.0 }
 0x118   : > { %v490_v46 = vmax.f32 %v382_v39, 0.0  ;;  %v476_v47 = vpop.f32.mrb[8].mxu1  ;;  %v385_v48 = vpop.f32.mrb[8].mxu0 }
 0x119   : > { %v1645_v49 = vpack.c.bf16 %v491_v43, %v488_v42  ;;  %v1639_v50 = vpack.c.bf16 %v489_v44, %v486_v41  ;;  %v477_v51 = vadd.f32 %v476_v47, %v267_v40  ;;  %v387_v52 = vpop.f32.mrb[9].mxu0  ;;  %v1543_v53 = vpop.f32.mrb[9].mxu1  ;;  %v386_v56 = vadd.f32 %v385_v48, %v267_v40 }
 0x11a   : > { %v1637_v54 = vpack.c.bf16 %v490_v46, %v487_v45  ;;  %v388_v55 = vadd.f32 %v387_v52, %v267_v40  ;;  %v530_v45 = vpop.permute.xlu1 %529 }
 0x11b   : > { %1646 = vmatpush3.bf16.msra.mxu1 %v1645_v49  ;;  %v494_v58 = vmax.f32 %v477_v51, 0.0  ;;  %v492_v60 = vmax.f32 %v386_v56, 0.0 }
 0x11c   : > { %v493_v57 = vmax.f32 %v388_v55, 0.0  ;;  %1638 = vmatprep.subr.bf16.mxu0 %v1637_v54  ;;  %1552 = vmatprep.subr.mxu1 %v1790_v16 }
 0x11d   : > { %1640 = vmatpush1.bf16.msra.mxu0 %v1639_v50 }
 0x11e   : > { %1415 = vmatprep.subr.msk.mxu0 %vm285_vm1, %v493_v57 }
 0x11f   : > { %1553 = vmatpush3.msk.msra.mxu1 %vm285_vm1, %v494_v58 }
 0x120   : > { %1555 = vmatmul.mubr.msk.f32.vlgmr.msra.gmra.mrb[10].mxu1 %vm269_vm2, %v1405_v59  ;;  %1655 = vmatprep.subr.bf16.mxu1 %v1788_v15 }
 0x121   : > { %1416 = vmatpush1.msk.msra.mxu0 %vm285_vm1, %v492_v60  ;;  %1557 = vmatprep.mubr.msk.f32.mxu1 %vm1789_vm0, %v1790_v16 }
 0x122   : > { %1417 = vmatmul.mubr.msk.f32.vlgmr.msra.gmra.mrb[10].mxu0 %vm269_vm2, %v1405_v59 }
 0x123   : > { %626 = vmatprep.mubr.f32.mxu0 %v1790_v16 }
 0x124   : > { %1558 = vmatmul.mubr.msk.f32.gmra.mrb[12].mxu1 %vm269_vm2, %v1406_v61 }
 0x125   : > { %1560 = vmatprep.mubr.msk.f32.mxu1 %vm1789_vm0, %v1790_v16 }
 0x126   : > { %1418 = vmatmul.mubr.msk.f32.gmra.mrb[12].mxu0 %vm269_vm2, %v1406_v61 }
 0x127   : > { %632 = vmatprep.mubr.f32.mxu0 %v1790_v16 }
 0x128   : > { %1561 = vmatmul.mubr.msk.f32.gmra.mrb[14].mxu1 %vm269_vm2, %v1407_v62 }
 0x129   : > { %1563 = vmatprep.mubr.msk.f32.mxu1 %vm1789_vm0, %v1790_v16 }
 0x12a   : > { %1419 = vmatmul.mubr.msk.f32.gmra.mrb[14].mxu0 %vm269_vm2, %v1407_v62  ;;  %v1428_v62 = vld [vmem:[%s2180_s1 + $0x50] sm:$0xff] }
 0x12b   : > { %638 = vmatprep.mubr.f32.mxu0 %v1790_v16 }
 0x12c   : > { %1564 = vmatmul.mubr.msk.f32.gmra.mrb[16].mxu1 %vm269_vm2, %v1408_v63 }
 0x12d   : > { %1566 = vmatprep.mubr.msk.f32.mxu1 %vm1789_vm0, %v1790_v16 }
 0x12e   : > { %1420 = vmatmul.mubr.msk.f32.gmra.mrb[16].mxu0 %vm269_vm2, %v1408_v63 }
 0x12f   : > { %644 = vmatprep.mubr.f32.mxu0 %v1790_v16 }
 0x130   : > { %1567 = vmatmul.mubr.msk.f32.gmra.mrb[18].mxu1 %vm269_vm2, %v1409_v0 }
 0x131   : > { %1579 = vmatprep.mubr.msk.f32.mxu1 %vm1789_vm0, %v1790_v16 }
 0x132   : > { %1421 = vmatmul.mubr.msk.f32.gmra.mrb[18].mxu0 %vm269_vm2, %v1409_v0 }
 0x133   : > { %881 = vmatprep.mubr.f32.mxu0 %v1790_v16 }
 0x1f3   : > { %v717_v1 = vpop.f32.mrb[10].mxu1 }
 0x1f4   : > { %v1556_v2 = vpop.f32.mrb[11].mxu1  ;;  %v718_v5 = vadd.f32 %v717_v1, %v510_v3  ;;  %v1429_v1 = vld [vmem:[%s2180_s1 + $0x58] sm:$0xff] }
 0x1f5   : > { %v622_v4 = vpop.f32.mrb[10].mxu0  ;;  %v1430_v2 = vld [vmem:[%s2180_s1 + $0x60] sm:$0xff] }
 0x1f6   : > { %v624_v6 = vpop.f32.mrb[11].mxu0  ;;  %v623_v9 = vadd.f32 %v622_v4, %v510_v3  ;;  %v743_v14 = vmax.f32 %v718_v5, 0.0  ;;  %v1432_v4 = vld [vmem:[%s2180_s1 + $0x70] sm:$0xf] }
 0x1f7   : > { %v722_v8 = vpop.f32.mrb[12].mxu1  ;;  %v625_v12 = vadd.f32 %v624_v6, %v510_v3  ;;  %v1431_v3 = vld [vmem:[%s2180_s1 + $0x68] sm:$0xff]  ;;  %v771_v6 = vpop.permute.xlu0 %770 }
 0x1f8   : > { %v723_v10 = vadd.f32 %v722_v8, %v515_v7  ;;  %v1559_v11 = vpop.f32.mrb[13].mxu1  ;;  %v741_v22 = vmax.f32 %v623_v9, 0.0  ;;  %v776_v8 = vpop.permute.xlu1 %775 }
 0x1f9   : > { %v628_v13 = vpop.f32.mrb[12].mxu0  ;;  %v742_v27 = vmax.f32 %v625_v12, 0.0 }
 0x1fa   : > { %v746_v17 = vmax.f32 %v723_v10, 0.0  ;;  %v629_v18 = vadd.f32 %v628_v13, %v515_v7  ;;  %v630_v19 = vpop.f32.mrb[13].mxu0 }
 0x1fb   : > { %v631_v20 = vadd.f32 %v630_v19, %v515_v7  ;;  %v727_v21 = vpop.f32.mrb[14].mxu1 }
 0x1fc   : > { %v1656_v23 = vpack.c.bf16 %v746_v17, %v743_v14  ;;  %v744_v24 = vmax.f32 %v629_v18, 0.0  ;;  %v1562_v25 = vpop.f32.mrb[15].mxu1  ;;  %v728_v31 = vadd.f32 %v727_v21, %v520_v26  ;;  %v781_v17 = vpop.permute.xlu0 %780 }
 0x1fd   : > { %v745_v28 = vmax.f32 %v631_v20, 0.0  ;;  %v634_v29 = vpop.f32.mrb[14].mxu0 }
 0x1fe   : > { %v1649_v30 = vpack.c.bf16 %v744_v24, %v741_v22  ;;  %1657 = vmatpush3.bf16.msra.mxu1 %v1656_v23  ;;  %v636_v32 = vpop.f32.mrb[15].mxu0  ;;  %v635_v36 = vadd.f32 %v634_v29, %v520_v26  ;;  %v749_v41 = vmax.f32 %v728_v31, 0.0  ;;  %v786_v29 = vpop.permute.xlu1 %785 }
 0x1ff   : > { %v1647_v34 = vpack.c.bf16 %v745_v28, %v742_v27  ;;  %v732_v35 = vpop.f32.mrb[16].mxu1  ;;  %1658 = vmatprep.subr.bf16.mxu1 %v1788_v15  ;;  %v637_v39 = vadd.f32 %v636_v32, %v520_v26 }
 0x200   : > { %v733_v37 = vadd.f32 %v732_v35, %v525_v33  ;;  %v1565_v38 = vpop.f32.mrb[17].mxu1  ;;  %v747_v48 = vmax.f32 %v635_v36, 0.0 }
 0x201   : > { %v640_v40 = vpop.f32.mrb[16].mxu0  ;;  %1648 = vmatprep.subr.bf16.mxu0 %v1647_v34  ;;  %v748_v53 = vmax.f32 %v637_v39, 0.0 }
 0x202   : > { %v752_v42 = vmax.f32 %v733_v37, 0.0  ;;  %v641_v43 = vadd.f32 %v640_v40, %v525_v33  ;;  %v642_v44 = vpop.f32.mrb[17].mxu0  ;;  %1650 = vmatpush1.bf16.msra.mxu0 %v1649_v30 }
 0x203   : > { %v643_v46 = vadd.f32 %v642_v44, %v525_v33  ;;  %v737_v47 = vpop.f32.mrb[18].mxu1 }
 0x204   : > { %v1659_v49 = vpack.c.bf16 %v752_v42, %v749_v41  ;;  %v750_v50 = vmax.f32 %v641_v43, 0.0  ;;  %v738_v51 = vadd.f32 %v737_v47, %v530_v45  ;;  %v1568_v52 = vpop.f32.mrb[19].mxu1  ;;  %v791_v42 = vpop.permute.xlu0 %790 }
 0x205   : > { %v751_v54 = vmax.f32 %v643_v46, 0.0  ;;  %v646_v55 = vpop.f32.mrb[18].mxu0 }
 0x206   : > { %v1653_v56 = vpack.c.bf16 %v750_v50, %v747_v48  ;;  %1660 = vmatpush3.bf16.msra.mxu1 %v1659_v49  ;;  %v648_v57 = vpop.f32.mrb[19].mxu0  ;;  %v755_v60 = vmax.f32 %v738_v51, 0.0  ;;  %v647_v61 = vadd.f32 %v646_v55, %v530_v45 }
 0x207   : > { %v1651_v58 = vpack.c.bf16 %v751_v54, %v748_v53  ;;  %v649_v59 = vadd.f32 %v648_v57, %v530_v45  ;;  %1577 = vmatprep.subr.mxu1 %v1790_v16 }
 0x208   : > { %v753_v0 = vmax.f32 %v647_v61, 0.0 }
 0x209   : > { %v754_v63 = vmax.f32 %v649_v59, 0.0  ;;  %1652 = vmatprep.subr.bf16.mxu0 %v1651_v58 }
 0x20a   : > { %1578 = vmatpush3.msk.msra.mxu1 %vm285_vm1, %v755_v60  ;;  %1654 = vmatpush1.bf16.msra.mxu0 %v1653_v56 }
 0x20b   : > { %1580 = vmatmul.mubr.msk.f32.vlgmr.msra.gmra.mrb[20].mxu1 %vm269_vm2, %v1428_v62  ;;  %1438 = vmatprep.subr.msk.mxu0 %vm285_vm1, %v754_v63 }
 0x20c   : > { %1582 = vmatprep.mubr.msk.f32.mxu1 %vm1789_vm0, %v1790_v16  ;;  %1669 = vmatprep.subr.bf16.mxu1 %v1788_v15 }
 0x20e   : > { %1439 = vmatpush1.msk.msra.mxu0 %vm285_vm1, %v753_v0 }
 0x20f   : > { %1583 = vmatmul.mubr.msk.f32.gmra.mrb[22].mxu1 %vm269_vm2, %v1429_v1  ;;  %1440 = vmatmul.mubr.msk.f32.vlgmr.msra.gmra.mrb[20].mxu0 %vm269_vm2, %v1428_v62  ;;  %v1451_v62 = vld [vmem:[%s2180_s1 + $0x78] sm:$0xff] }
 0x210   : > { %1585 = vmatprep.mubr.msk.f32.mxu1 %vm1789_vm0, %v1790_v16  ;;  %887 = vmatprep.mubr.f32.mxu0 %v1790_v16 }
 0x213   : > { %1586 = vmatmul.mubr.msk.f32.gmra.mrb[24].mxu1 %vm269_vm2, %v1430_v2  ;;  %1441 = vmatmul.mubr.msk.f32.gmra.mrb[22].mxu0 %vm269_vm2, %v1429_v1 }
 0x214   : > { %1588 = vmatprep.mubr.msk.f32.mxu1 %vm1789_vm0, %v1790_v16  ;;  %893 = vmatprep.mubr.f32.mxu0 %v1790_v16 }
 0x217   : > { %1589 = vmatmul.mubr.msk.f32.gmra.mrb[26].mxu1 %vm269_vm2, %v1431_v3  ;;  %1442 = vmatmul.mubr.msk.f32.gmra.mrb[24].mxu0 %vm269_vm2, %v1430_v2 }
 0x218   : > { %1591 = vmatprep.mubr.msk.f32.mxu1 %vm1789_vm0, %v1790_v16  ;;  %899 = vmatprep.mubr.f32.mxu0 %v1790_v16 }
 0x21b   : > { %1592 = vmatmul.mubr.msk.f32.gmra.mrb[28].mxu1 %vm269_vm2, %v1432_v4  ;;  %1443 = vmatmul.mubr.msk.f32.gmra.mrb[26].mxu0 %vm269_vm2, %v1431_v3  ;;  %v1452_v3 = vld [vmem:[%s2180_s1 + $0x80] sm:$0xff] }
 0x21c   : > { %905 = vmatprep.mubr.f32.mxu0 %v1790_v16  ;;  %1604 = vmatprep.mubr.msk.f32.mxu1 %vm1789_vm0, %v1790_v16 }
 0x21f   : > { %1444 = vmatmul.mubr.msk.f32.gmra.mrb[28].mxu0 %vm269_vm2, %v1432_v4 }
 0x220   : > { %1139 = vmatprep.mubr.f32.mxu0 %v1790_v16 }
 0x2de   : > { %v978_v5 = vpop.f32.mrb[20].mxu1 }
 0x2df   : > { %v1581_v7 = vpop.f32.mrb[21].mxu1  ;;  %v979_v9 = vadd.f32 %v978_v5, %v771_v6  ;;  %v1453_v5 = vld [vmem:[%s2180_s1 + $0x88] sm:$0xff] }
 0x2e0   : > { %v1455_v7 = vld [vmem:[%s2180_s1 + $0x98] sm:$0xf] }
 0x2e1   : > { %v1004_v18 = vmax.f32 %v979_v9, 0.0 }
 0x2e2   : > { %v983_v10 = vpop.f32.mrb[22].mxu1  ;;  %v883_v11 = vpop.f32.mrb[20].mxu0 }
 0x2e3   : > { %v984_v12 = vadd.f32 %v983_v10, %v776_v8  ;;  %v885_v13 = vpop.f32.mrb[21].mxu0  ;;  %v1584_v14 = vpop.f32.mrb[23].mxu1  ;;  %v884_v20 = vadd.f32 %v883_v11, %v771_v6 }
 0x2e4   : > { %v886_v21 = vadd.f32 %v885_v13, %v771_v6  ;;  %v1454_v6 = vld [vmem:[%s2180_s1 + $0x90] sm:$0xff]  ;;  %v1037_v10 = vpop.permute.xlu0 %1036  ;;  %v1032_v11 = vpop.permute.xlu1 %1031 }
 0x2e5   : > { %v1007_v19 = vmax.f32 %v984_v12, 0.0  ;;  %v1002_v30 = vmax.f32 %v884_v20, 0.0 }
 0x2e6   : > { %v988_v22 = vpop.f32.mrb[24].mxu1  ;;  %v889_v23 = vpop.f32.mrb[22].mxu0  ;;  %v1003_v33 = vmax.f32 %v886_v21, 0.0 }
 0x2e7   : > { %v1670_v24 = vpack.c.bf16 %v1007_v19, %v1004_v18  ;;  %v890_v25 = vadd.f32 %v889_v23, %v776_v8  ;;  %v891_v26 = vpop.f32.mrb[23].mxu0  ;;  %v1587_v27 = vpop.f32.mrb[25].mxu1  ;;  %v989_v31 = vadd.f32 %v988_v22, %v781_v17 }
 0x2e8   : > { %v892_v28 = vadd.f32 %v891_v26, %v776_v8 }
 0x2e9   : > { %v1005_v32 = vmax.f32 %v890_v25, 0.0  ;;  %1671 = vmatpush3.bf16.msra.mxu1 %v1670_v24  ;;  %v1010_v43 = vmax.f32 %v989_v31, 0.0 }
 0x2ea   : > { %v1006_v34 = vmax.f32 %v892_v28, 0.0  ;;  %v993_v35 = vpop.f32.mrb[26].mxu1  ;;  %v895_v36 = vpop.f32.mrb[24].mxu0  ;;  %1672 = vmatprep.subr.bf16.mxu1 %v1788_v15 }
 0x2eb   : > { %v1663_v37 = vpack.c.bf16 %v1005_v32, %v1002_v30  ;;  %v994_v38 = vadd.f32 %v993_v35, %v786_v29  ;;  %v897_v39 = vpop.f32.mrb[25].mxu0  ;;  %v1590_v40 = vpop.f32.mrb[27].mxu1  ;;  %v896_v45 = vadd.f32 %v895_v36, %v781_v17 }
 0x2ec   : > { %v1661_v41 = vpack.c.bf16 %v1006_v34, %v1003_v33  ;;  %v898_v46 = vadd.f32 %v897_v39, %v781_v17 }
 0x2ed   : > { %v1013_v44 = vmax.f32 %v994_v38, 0.0  ;;  %v1008_v54 = vmax.f32 %v896_v45, 0.0 }
 0x2ee   : > { %v998_v47 = vpop.f32.mrb[28].mxu1  ;;  %v901_v48 = vpop.f32.mrb[26].mxu0  ;;  %1662 = vmatprep.subr.bf16.mxu0 %v1661_v41  ;;  %v1009_v56 = vmax.f32 %v898_v46, 0.0 }
 0x2ef   : > { %v1673_v49 = vpack.c.bf16 %v1013_v44, %v1010_v43  ;;  %v999_v50 = vadd.f32 %v998_v47, %v791_v42  ;;  %v902_v51 = vadd.f32 %v901_v48, %v786_v29  ;;  %v903_v52 = vpop.f32.mrb[27].mxu0  ;;  %1664 = vmatpush1.bf16.msra.mxu0 %v1663_v37  ;;  %v1593_v53 = vpop.f32.mrb[29].mxu1 }
 0x2f0   : > { %v904_v15 = vadd.f32 %v903_v52, %v786_v29 }
 0x2f1   : > { %v1011_v55 = vmax.f32 %v902_v51, 0.0  ;;  %1674 = vmatpush3.bf16.msra.mxu1 %v1673_v49  ;;  %v1016_v59 = vmax.f32 %v999_v50, 0.0  ;;  %v1792_v49 = vmov 1966171168   ;;  %v1282_v51 = vlaneseq }
 0x2f2   : > { %v1012_v57 = vmax.f32 %v904_v15, 0.0  ;;  %v907_v58 = vpop.f32.mrb[28].mxu0  ;;  %1602 = vmatprep.subr.mxu1 %v1790_v16  ;;  %v1280_v50 = vunpack.c.l.s4 %v1792_v49 }
 0x2f3   : > { %v1667_v60 = vpack.c.bf16 %v1011_v55, %v1008_v54  ;;  %v909_v61 = vpop.f32.mrb[29].mxu0  ;;  %v908_v1 = vadd.f32 %v907_v58, %v791_v42  ;;  %vm1304_vm3 = vcmp.lt.s32.totalorder %v1282_v51, 384 }
 0x2f4   : > { %v1665_v63 = vpack.c.bf16 %v1012_v57, %v1009_v56  ;;  %v910_v0 = vadd.f32 %v909_v61, %v791_v42  ;;  %v1281_v58 = vunpack.c.0.s8 %v1280_v50 }
 0x2f5   : > { %1603 = vmatpush3.msk.msra.mxu1 %vm285_vm1, %v1016_v59  ;;  %v1014_v4 = vmax.f32 %v908_v1, 0.0  ;;  %v1283_v59 = vshrl.u32 %v1282_v51, 7 }
 0x2f6   : > { %v1015_v2 = vmax.f32 %v910_v0, 0.0  ;;  %1605 = vmatmul.mubr.msk.f32.vlgmr.msra.gmra.mrb[30].mxu1 %vm269_vm2, %v1451_v62  ;;  %1666 = vmatprep.subr.bf16.mxu0 %v1665_v63 }
 0x2f7   : > { %1668 = vmatpush1.bf16.msra.mxu0 %v1667_v60  ;;  %1607 = vmatprep.mubr.msk.f32.mxu1 %vm1789_vm0, %v1790_v16  ;;  %v1284_v1 = vsub.s32 %v1281_v58, %v1283_v59 }
 0x2f8   : > { %1461 = vmatprep.subr.msk.mxu0 %vm285_vm1, %v1015_v2 }
 0x2fa   : > { %1608 = vmatmul.mubr.msk.f32.gmra.mrb[32].mxu1 %vm269_vm2, %v1452_v3 }
 0x2fb   : > { %1462 = vmatpush1.msk.msra.mxu0 %vm285_vm1, %v1014_v4  ;;  %1610 = vmatprep.mubr.msk.f32.mxu1 %vm1789_vm0, %v1790_v16 }
 0x2fc   : > { %1463 = vmatmul.mubr.msk.f32.vlgmr.msra.gmra.mrb[30].mxu0 %vm269_vm2, %v1451_v62 }
 0x2fd   : > { %1145 = vmatprep.mubr.f32.mxu0 %v1790_v16 }
 0x2fe   : > { %1611 = vmatmul.mubr.msk.f32.gmra.mrb[34].mxu1 %vm269_vm2, %v1453_v5 }
 0x2ff   : > { %1613 = vmatprep.mubr.msk.f32.mxu1 %vm1789_vm0, %v1790_v16 }
 0x300   : > { %1464 = vmatmul.mubr.msk.f32.gmra.mrb[32].mxu0 %vm269_vm2, %v1452_v3 }
 0x301   : > { %1151 = vmatprep.mubr.f32.mxu0 %v1790_v16 }
 0x302   : > { %1614 = vmatmul.mubr.msk.f32.gmra.mrb[36].mxu1 %vm269_vm2, %v1454_v6 }
 0x303   : > { %1616 = vmatprep.mubr.msk.f32.mxu1 %vm1789_vm0, %v1790_v16 }
 0x304   : > { %1465 = vmatmul.mubr.msk.f32.gmra.mrb[34].mxu0 %vm269_vm2, %v1453_v5 }
 0x305   : > { %1155 = vmatprep.mubr.f32.mxu0 %v1790_v16 }
 0x306   : > { %1617 = vmatmul.mubr.msk.f32.gmra.mrb[38].mxu1 %vm269_vm2, %v1455_v7 }
 0x308   : > { %1466 = vmatmul.mubr.msk.f32.gmra.mrb[36].mxu0 %vm269_vm2, %v1454_v6 }
 0x309   : > { %1159 = vmatprep.mubr.f32.mxu0 %v1790_v16 }
 0x30c   : > { %1467 = vmatmul.mubr.msk.f32.gmra.mrb[38].mxu0 %vm269_vm2, %v1455_v7 }
 0x3c9   : > { %v1230_v8 = vpop.f32.mrb[30].mxu1 }
 0x3ca   : > { %v1606_v9 = vpop.f32.mrb[31].mxu1  ;;  %v1231_v13 = vadd.f32 %v1230_v8, %v1032_v11 }
 0x3cd   : > { %v1235_v12 = vpop.f32.mrb[32].mxu1 }
 0x3ce   : > { %v1236_v14 = vadd.f32 %v1235_v12, %v1037_v10  ;;  %v1609_v17 = vpop.f32.mrb[33].mxu1 }
 0x3cf   : > { %v1141_v18 = vpop.f32.mrb[30].mxu0 }
 0x3d0   : > { %v1253_v19 = vmul.f32 %v1236_v14, %v1231_v13  ;;  %v1143_v20 = vpop.f32.mrb[31].mxu0  ;;  %v1142_v16 = vadd.f32 %v1141_v18, %v1032_v11 }
 0x3d1   : > { %v1240_v21 = vpop.f32.mrb[34].mxu1  ;;  %v1144_v29 = vadd.f32 %v1143_v20, %v1032_v11 }
 0x3d2   : > { %v1268_v22 = vsel %vm285_vm1, %v1253_v19, 0.0  ;;  %v1612_v23 = vpop.f32.mrb[35].mxu1 }
 0x3d3   : > { %v1269_v24 = vrot.slane %v1268_v22, 4  ;;  %v1147_v25 = vpop.f32.mrb[32].mxu0 }
 0x3d4   : > { %v1148_v26 = vadd.f32 %v1147_v25, %v1037_v10  ;;  %v1149_v27 = vpop.f32.mrb[33].mxu0 }
 0x3d5   : > { %v1270_v28 = vadd.f32 %v1269_v24, %v1268_v22  ;;  %v1150_v30 = vadd.f32 %v1149_v27, %v1037_v10  ;;  %v1244_v31 = vpop.f32.mrb[36].mxu1 }
 0x3d6   : > { %v1251_v32 = vmul.f32 %v1148_v26, %v1142_v16  ;;  %v1615_v33 = vpop.f32.mrb[37].mxu1 }
 0x3d7   : > { %v1252_v34 = vmul.f32 %v1150_v30, %v1144_v29  ;;  %v1153_v35 = vpop.f32.mrb[34].mxu0  ;;  %v1271_v36 = vrot.slane %v1270_v28, 2 }
 0x3d8   : > { %v1254_v37 = vsel %vm285_vm1, %v1251_v32, 0.0  ;;  %v1154_v38 = vpop.f32.mrb[35].mxu0 }
 0x3d9   : > { %v1255_v39 = vrot.slane %v1254_v37, 4  ;;  %v1261_v40 = vsel %vm285_vm1, %v1252_v34, 0.0  ;;  %v1248_v41 = vpop.f32.mrb[38].mxu1  ;;  %v1272_v46 = vadd.f32 %v1271_v36, %v1270_v28 }
 0x3da   : > { %v1262_v42 = vrot.slane %v1261_v40, 4  ;;  %v1618_v43 = vpop.f32.mrb[39].mxu1 }
 0x3db   : > { %v1256_v44 = vadd.f32 %v1255_v39, %v1254_v37  ;;  %v1157_v45 = vpop.f32.mrb[36].mxu0  ;;  %v1273_v55 = vrot.slane %v1272_v46, 1 }
 0x3dc   : > { %v1263_v47 = vadd.f32 %v1262_v42, %v1261_v40  ;;  %v1158_v48 = vpop.f32.mrb[37].mxu0 }
 0x3dd   : > { %v1257_v52 = vrot.slane %v1256_v44, 2  ;;  %v1274_v63 = vadd.f32 %v1273_v55, %v1272_v46 }
 0x3de   : > { %v1264_v53 = vrot.slane %v1263_v47, 2 }
 0x3df   : > { %v1258_v15 = vadd.f32 %v1257_v52, %v1256_v44  ;;  %v1161_v54 = vpop.f32.mrb[38].mxu0  ;;  %v1292_v4 = vrot.slane %v1274_v63, %v1284_v1 }
 0x3e0   : > { %v1265_v56 = vadd.f32 %v1264_v53, %v1263_v47  ;;  %v1162_v57 = vpop.f32.mrb[39].mxu0 }
 0x3e1   : > { %v1259_v60 = vrot.slane %v1258_v15, 1 }
 0x3e2   : > { %v1266_v61 = vrot.slane %v1265_v56, 1 }
 0x3e3   : > { %v1260_v62 = vadd.f32 %v1259_v60, %v1258_v15 }
 0x3e4   : > { %v1267_v0 = vadd.f32 %v1266_v61, %v1265_v56 }
 0x3e6   : > { %v1278_v2 = vcombine.low %v1260_v62, %v1267_v0 }
 0x3e8   : > { %v1285_v3 = vrot.slane %v1278_v2, %v1284_v1 }
 0x3ea   : > { %v1293_v5 = vcombine.low %v1285_v3, %v1292_v4 }
 0x3ec   : > { %v1300_v6 = vrot.slane %v1293_v5, %v1284_v1 }
 0x3ee   : > { %1306 = vst.msk [vmem:[%s216_s24] sm:$0x7] %vm1304_vm3, %v1300_v6 }
 0x3ef   : > { %1737 = shalt.err (!%p1734_p5)
}
 0x3f0   : > { %s1738_s4 = scalar_lea.hbm %s2135_s28, 48  ;;  %s1742_s9 = scalar_lea.hbm %s2182_s3, 96 }
 0x3f1   : > { %p1739_p7 = scmp.ne.s32.totalorder %s2135_s28, %s1738_s4  ;;  %p1743_p12 = scmp.lt.u32.totalorder %s2135_s28, %s2182_s3 }
 0x3f2   : > { %p1744_p13 = scmp.lt.u32.totalorder %s1742_s9, %s1738_s4  ;;  %p1746_p1 = scmp.lt.u32.totalorder %s1738_s4, %s2135_s28 }
 0x3f3   : > { %p1740_p10 = pnand %p1739_p7, %p1852_p6 }
 0x3f4   : > { %p1745_p0 = por %p1744_p13, %p1743_p12 }
 0x3f5   : > { %p1741_p11 = pneg %p1740_p10 }
 0x3f6   : > { %p1747_p2 = por %p1746_p1, %p1745_p0 }
 0x3f8   : > { %p1748_p3 = pnand %p1747_p2, %p1741_p11 }
 0x3fa   : > { %1751 = shalt.err (!%p1748_p3)
}
 0x3fb   : > { %1678 = dma.vmem_to_hbm [thread:$0]  (%p1852_p6), %s2137_s25, 48, %s2135_s28, %s1308_s29  }
 0x3fc PF: > { %s1334_s17 = sand.u32 1, %s1774_s12   ;;  %p1681_p4 = pnand %p1389_p9, %p1856_p8 }
 0x3fd   : > { %s1335_s19 = scalar_lea.sflag [#allocation4], %s1334_s17 }
 0x3fe   : > { %1769 = dma.done.wait (!%p1681_p4), %s1335_s19, 48  }
 0x3ff   : > { %1771 = vsyncadd (!%p1681_p4), %s1335_s19, 4294967248  ;;  %p13_p5 = scmp.ge.s32.totalorder %s1837_s18, 4   ;;  %s2185_s12 = smov %s1778_s13 }
 0x400   : > { %s2186_s13 = smov %s1782_s14  ;;  %s2187_s14 = smov %s1850_s21 }
 0x401   : > { %s2188_s15 = smov %s1837_s18  ;;  %15 = sbr.rel (!%p13_p5) target bundleno = 3 (0x3), region = 101 }
 0x408   :  { %1340 = vsyncpa [#allocation4], 1 }
 0x409   :  { %1342 = vsyncpa [#allocation4 + $0x1], 1 }

</bundles_post_ra>
